<compile_context>
chip_gen: v6e
topology: v6e:2x2x1
jax: 0.10.0
libtpu: 0.0.40
codegen_flags: <defaults>
</compile_context>

<pallas_src>
from functools import partial

import jax
import jax.numpy as jnp
from jax.experimental import pallas as pl
from jax.experimental.pallas import tpu as pltpu


def _nce_kernel(k_ref, q_ref, out_ref, m_ref, l_ref, d_ref, *,
                tm, tn, n_valid, q_resident, mask_cols):
    # k_ref:   (tm, Dp)  -- rows already scaled by 1/temperature.
    # q_ref:   (n_cols, Dp) if q_resident else (tn, Dp).
    # out_ref: (tm, 1) per-row loss, written once at the last column tile.
    # scratch m/l/d: (tm, 1) f32 online-logsumexp state + positive logit.
    i = pl.program_id(0)                    # row tile    ("parallel")
    j = pl.program_id(1)                    # column tile ("arbitrary" reduction)
    last_j = pl.num_programs(1) - 1

    @pl.when(j == 0)
    def _():
        m_ref[...] = jnp.full_like(m_ref, -jnp.inf)
        l_ref[...] = jnp.zeros_like(l_ref)
        d_ref[...] = jnp.zeros_like(d_ref)

    if q_resident:
        # Whole (padded) q lives in VMEM for the entire grid; slice the
        # current column tile out of it.
        q_tile = q_ref[pl.ds(pl.multiple_of(j * tn, tn), tn), :]
    else:
        q_tile = q_ref[...]

    # (tm, tn) tile of scaled logits: contract the last dims of both operands
    # (k @ q.T without any in-kernel transpose), f32 accumulation on the MXU.
    s = jax.lax.dot_general(
        k_ref[...], q_tile,
        dimension_numbers=(((1,), (1,)), ((), ())),
        preferred_element_type=jnp.float32)

    def lse_update(s_eff):
        m_prev = m_ref[...]
        m_new = jnp.maximum(m_prev, jnp.max(s_eff, axis=1, keepdims=True))
        l_ref[...] = (l_ref[...] * jnp.exp(m_prev - m_new)
                      + jnp.sum(jnp.exp(s_eff - m_new), axis=1, keepdims=True))
        m_ref[...] = m_new

    if mask_cols:
        # Padded q rows only exist in the last column tile; every other tile
        # takes the unmasked fast path (no iota / compare / select).
        @pl.when(j != last_j)
        def _():
            lse_update(s)

        @pl.when(j == last_j)
        def _():
            col_ids = j * tn + jax.lax.broadcasted_iota(jnp.int32, (tm, tn), 1)
            lse_update(jnp.where(col_ids < n_valid, s, -jnp.inf))
    else:
        lse_update(s)

    # Positive (target) logit: target[r] = r, i.e. the global diagonal.  Only
    # tiles whose row range [i*tm, (i+1)*tm) and column range [j*tn, (j+1)*tn)
    # overlap can contain it (correct even when tm != tn).
    @pl.when(jnp.logical_and(i * tm < (j + 1) * tn, j * tn < (i + 1) * tm))
    def _():
        row_ids = i * tm + jax.lax.broadcasted_iota(jnp.int32, (tm, tn), 0)
        col_ids = j * tn + jax.lax.broadcasted_iota(jnp.int32, (tm, tn), 1)
        diag = jnp.logical_and(row_ids == col_ids, col_ids < n_valid)
        d_ref[...] += jnp.sum(jnp.where(diag, s, 0.0), axis=1, keepdims=True)

    @pl.when(j == last_j)
    def _():
        # Cross-entropy with target = row index: lse(row) - logit[row, row].
        out_ref[...] = m_ref[...] + jnp.log(l_ref[...]) - d_ref[...]


def _round_up(x, m):
    return ((x + m - 1) // m) * m


def _vmem_limit_bytes():
    # 3/4 of physical VMEM, capped at 100 MiB: ~96 MiB on v5e/v6e (128 MiB
    # parts), 48 MiB on v7x (64 MiB).  Conservative 48 MiB fallback if the
    # hardware query is unavailable.
    try:
        cap = int(pltpu.get_tpu_info().vmem_capacity_bytes)
        return min(100 * 2 ** 20, (3 * cap) // 4)
    except Exception:
        return 48 * 2 ** 20


def nce_loss(k, q, temperature, *, tm=None, tn=None,
             compute_dtype=jnp.bfloat16, q_resident=None):
    """Pallas implementation of NCELoss.forward(k, q) -> scalar."""
    N, D = k.shape
    assert q.shape == (N, D)

    # Tile sizes: big tiles amortize the per-grid-step overhead and fill the
    # MXU; tm <= 512 keeps >= 2 row tiles (for megacore sharding) once N > 512.
    if tm is None:
        tm = min(512, _round_up(N, 8))
    if tn is None:
        tn = min(512, _round_up(N, 128))
    assert tm % 8 == 0 and tn % 128 == 0

    d_pad = _round_up(D, 128)            # full MXU contraction dim
    n_rows = _round_up(N, tm)            # pad k rows to the row-tile size
    n_cols = _round_up(N, tn)            # pad q rows to the column-tile size

    # Fold 1/temperature into k once (N*D) instead of scaling N^2 logits.
    inv_t = jnp.float32(1.0 / float(temperature))
    k_c = (k.astype(jnp.float32) * inv_t).astype(compute_dtype)
    q_c = q.astype(compute_dtype)
    k_p = jnp.pad(k_c, ((0, n_rows - N), (0, d_pad - D)))
    q_p = jnp.pad(q_c, ((0, n_cols - N), (0, d_pad - D)))

    itemsize = jnp.dtype(compute_dtype).itemsize
    vmem_limit = _vmem_limit_bytes()
    if q_resident is None:
        # Resident q is double-buffered by the pipeline; keep it well under
        # the scoped-VMEM budget so k tiles + scratch still fit (v7x: 64 MiB).
        q_resident = (2 * n_cols * d_pad * itemsize
                      <= min(vmem_limit // 2, 32 * 2 ** 20))

    if q_resident:
        # Constant block index: q is DMA'd from HBM exactly once.
        q_spec = pl.BlockSpec((n_cols, d_pad), lambda i, j: (0, 0))
    else:
        # Fallback: stream (tn, Dp) column tiles of q per grid step.
        q_spec = pl.BlockSpec((tn, d_pad), lambda i, j: (j, 0))

    grid = (n_rows // tm, n_cols // tn)

    per_row = pl.pallas_call(
        partial(_nce_kernel, tm=tm, tn=tn, n_valid=N,
                q_resident=q_resident, mask_cols=(n_cols != N)),
        out_shape=jax.ShapeDtypeStruct((n_rows, 1), jnp.float32),
        grid_spec=pltpu.PrefetchScalarGridSpec(
            num_scalar_prefetch=0,
            grid=grid,
            in_specs=[
                pl.BlockSpec((tm, d_pad), lambda i, j: (i, 0)),   # k row tile
                q_spec,                                           # q (resident or tiled)
            ],
            out_specs=pl.BlockSpec((tm, 1), lambda i, j: (i, 0)),
            scratch_shapes=[pltpu.VMEM((tm, 1), jnp.float32)] * 3,  # m, l, diag
        ),
        compiler_params=pltpu.CompilerParams(
            dimension_semantics=("parallel", "arbitrary"),
            vmem_limit_bytes=int(vmem_limit),
        ),
    )(k_p, q_p)

    # Drop padded rows and finish the mean in plain JAX (N floats only).
    return jnp.mean(per_row[:N, 0])


def _reference(k, q, temperature):
    logits = jnp.dot(k, q.T, precision=jax.lax.Precision.HIGHEST) / temperature
    lse = jax.scipy.special.logsumexp(logits, axis=1)
    diag = jnp.diagonal(logits)
    return jnp.mean(lse - diag)


if __name__ == "__main__":
    key = jax.random.PRNGKey(0)
    k1, k2, k3, k4 = jax.random.split(key, 4)

    # --- Test A: small shape matching the module (N=8, D=32), f32 compute
    #     path, tight tolerance (validates the exact math / masking logic).
    N, D = 8, 32
    k = jax.random.normal(k1, (N, D), dtype=jnp.float32)
    q = jax.random.normal(k2, (N, D), dtype=jnp.float32)
    k = k / jnp.linalg.norm(k, axis=1, keepdims=True)
    q = q / jnp.linalg.norm(q, axis=1, keepdims=True)

    loss = jax.block_until_ready(nce_loss(k, q, 0.07, compute_dtype=jnp.float32))
    ref = _reference(k, q, 0.07)
    assert jnp.allclose(loss, ref, rtol=1e-3, atol=1e-3), (loss, ref)

    # --- Test B: N=300, D=96 with forced 128x128 tiles -> 3x3 grid; exercises
    #     the online logsumexp across column tiles, diagonal gating, masked
    #     last column tile and the VMEM-resident-q path.  bf16 compute.
    N2, D2 = 300, 96
    kb = jax.random.normal(k3, (N2, D2), dtype=jnp.float32)
    qb = jax.random.normal(k4, (N2, D2), dtype=jnp.float32)
    kb = kb / jnp.linalg.norm(kb, axis=1, keepdims=True)
    qb = qb / jnp.linalg.norm(qb, axis=1, keepdims=True)
    ref2 = _reference(kb, qb, 0.07)

    loss2 = jax.block_until_ready(nce_loss(kb, qb, 0.07, tm=128, tn=128))
    assert jnp.allclose(loss2, ref2, rtol=2e-2, atol=2e-2), (loss2, ref2)

    # --- Test C: tm != tn (128 x 256) and forced streamed-q fallback path;
    #     exercises the range-overlap diagonal predicate with unequal tiles.
    loss3 = jax.block_until_ready(
        nce_loss(kb, qb, 0.07, tm=128, tn=256, q_resident=False))
    assert jnp.allclose(loss3, ref2, rtol=2e-2, atol=2e-2), (loss3, ref2)

    # --- Test D: default auto tile selection (single-tile grid for N=300).
    loss4 = jax.block_until_ready(nce_loss(kb, qb, 0.07))
    assert jnp.allclose(loss4, ref2, rtol=2e-2, atol=2e-2), (loss4, ref2)

    print("KERNEL_OK")
</pallas_src>

<mosaic_0001>
module attributes {stable_mosaic.version = 11 : i64} {
  func.func @_nce_kernel(%arg0: i32, %arg1: i32, %arg2: memref<8x128xf32, #tpu.memory_space<vmem>>, %arg3: memref<128x128xf32, #tpu.memory_space<vmem>>, %arg4: memref<8x1xf32, #tpu.memory_space<vmem>>, %arg5: memref<8x1xf32, #tpu.memory_space<vmem>>, %arg6: memref<8x1xf32, #tpu.memory_space<vmem>>, %arg7: memref<8x1xf32, #tpu.memory_space<vmem>>) attributes {dimension_semantics = [#tpu.dimension_semantics<parallel>, #tpu.dimension_semantics<arbitrary>], iteration_bounds = array<i64: 1, 1>, scalar_prefetch = 0 : i64, scratch_operands = 3 : i64, tpu.core_type = #tpu.core_type<tc>, window_params = [{transform_indices = @transform_0, window_bounds = array<i64: 8, 128>}, {pipeline_mode = #tpu.pipeline_mode<synchronous>, transform_indices = @transform_1, window_bounds = array<i64: 128, 128>}, {transform_indices = @transform_2, window_bounds = array<i64: 8, 1>}]} {
    %c0_i32 = arith.constant 0 : i32
    %0 = arith.cmpi eq, %arg1, %c0_i32 : i32
    %1 = arith.extui %0 : i1 to i32
    %c0_i32_0 = arith.constant 0 : i32
    %2 = arith.cmpi ne, %1, %c0_i32_0 : i32
    scf.if %2 {
      %cst_14 = arith.constant 0xFF800000 : f32
      %29 = vector.broadcast %cst_14 : f32 to vector<8x1xf32>
      %c0_15 = arith.constant 0 : index
      %c0_16 = arith.constant 0 : index
      %30 = vector.load %arg5[%c0_15, %c0_16] : memref<8x1xf32, #tpu.memory_space<vmem>>, vector<8x1xf32>
      tpu.vector_store %arg5[%c0_15, %c0_16], %29 {strides = array<i32>} : memref<8x1xf32, #tpu.memory_space<vmem>>, vector<8x1xf32>,
      %cst_17 = arith.constant 0.000000e+00 : f32
      %31 = vector.broadcast %cst_17 : f32 to vector<8x1xf32>
      %c0_18 = arith.constant 0 : index
      %c0_19 = arith.constant 0 : index
      %32 = vector.load %arg6[%c0_18, %c0_19] : memref<8x1xf32, #tpu.memory_space<vmem>>, vector<8x1xf32>
      tpu.vector_store %arg6[%c0_18, %c0_19], %31 {strides = array<i32>} : memref<8x1xf32, #tpu.memory_space<vmem>>, vector<8x1xf32>,
      %cst_20 = arith.constant 0.000000e+00 : f32
      %33 = vector.broadcast %cst_20 : f32 to vector<8x1xf32>
      %c0_21 = arith.constant 0 : index
      %c0_22 = arith.constant 0 : index
      %34 = vector.load %arg7[%c0_21, %c0_22] : memref<8x1xf32, #tpu.memory_space<vmem>>, vector<8x1xf32>
      tpu.vector_store %arg7[%c0_21, %c0_22], %33 {strides = array<i32>} : memref<8x1xf32, #tpu.memory_space<vmem>>, vector<8x1xf32>,
    } else {
    }
    %c128_i32 = arith.constant 128 : i32
    %3 = arith.muli %arg1, %c128_i32 : i32
    %4 = tpu.assume_multiple %3, 128 : i32
    %5 = arith.index_cast %4 : i32 to index
    %c0 = arith.constant 0 : index
    %6 = vector.load %arg3[%5, %c0] : memref<128x128xf32, #tpu.memory_space<vmem>>, vector<128x128xf32>
    %c0_1 = arith.constant 0 : index
    %c0_2 = arith.constant 0 : index
    %7 = vector.load %arg2[%c0_1, %c0_2] : memref<8x128xf32, #tpu.memory_space<vmem>>, vector<8x128xf32>
    %cst = arith.constant dense<0.000000e+00> : vector<8x128xf32>
    %8 = tpu.matmul %7, %6, %cst {dimension_numbers = #tpu.dot_dimension_numbers<[1], [1], [0], [0], [0, 0, 1, 0], [], []>} : vector<8x128xf32>, vector<128x128xf32>, vector<8x128xf32> -> vector<8x128xf32>
    %c0_i32_3 = arith.constant 0 : i32
    %9 = arith.cmpi ne, %arg1, %c0_i32_3 : i32
    %10 = arith.extui %9 : i1 to i32
    %c0_i32_4 = arith.constant 0 : i32
    %11 = arith.cmpi ne, %10, %c0_i32_4 : i32
    scf.if %11 {
      %c0_14 = arith.constant 0 : index
      %c0_15 = arith.constant 0 : index
      %29 = vector.load %arg5[%c0_14, %c0_15] : memref<8x1xf32, #tpu.memory_space<vmem>>, vector<8x1xf32>
      %cst_16 = arith.constant dense<0xFF800000> : vector<8xf32>
      %30 = vector.multi_reduction <maximumf>, %8, %cst_16 [1] : vector<8x128xf32> to vector<8xf32>
      %31 = vector.shape_cast %30 : vector<8xf32> to vector<8x1xf32>
      %32 = arith.maximumf %29, %31 : vector<8x1xf32>
      %c0_17 = arith.constant 0 : index
      %c0_18 = arith.constant 0 : index
      %33 = vector.load %arg6[%c0_17, %c0_18] : memref<8x1xf32, #tpu.memory_space<vmem>>, vector<8x1xf32>
      %34 = arith.subf %29, %32 : vector<8x1xf32>
      %35 = math.exp %34 : vector<8x1xf32>
      %36 = arith.mulf %33, %35 : vector<8x1xf32>
      %37 = vector.broadcast %32 : vector<8x1xf32> to vector<8x128xf32>
      %38 = arith.subf %8, %37 : vector<8x128xf32>
      %39 = math.exp %38 : vector<8x128xf32>
      %cst_19 = arith.constant dense<0.000000e+00> : vector<8xf32>
      %40 = vector.multi_reduction <add>, %39, %cst_19 [1] : vector<8x128xf32> to vector<8xf32>
      %41 = vector.shape_cast %40 : vector<8xf32> to vector<8x1xf32>
      %42 = arith.addf %36, %41 : vector<8x1xf32>
      %c0_20 = arith.constant 0 : index
      %c0_21 = arith.constant 0 : index
      %43 = vector.load %arg6[%c0_20, %c0_21] : memref<8x1xf32, #tpu.memory_space<vmem>>, vector<8x1xf32>
      tpu.vector_store %arg6[%c0_20, %c0_21], %42 {strides = array<i32>} : memref<8x1xf32, #tpu.memory_space<vmem>>, vector<8x1xf32>,
      %c0_22 = arith.constant 0 : index
      %c0_23 = arith.constant 0 : index
      %44 = vector.load %arg5[%c0_22, %c0_23] : memref<8x1xf32, #tpu.memory_space<vmem>>, vector<8x1xf32>
      tpu.vector_store %arg5[%c0_22, %c0_23], %32 {strides = array<i32>} : memref<8x1xf32, #tpu.memory_space<vmem>>, vector<8x1xf32>,
    } else {
    }
    %c0_i32_5 = arith.constant 0 : i32
    %12 = arith.cmpi eq, %arg1, %c0_i32_5 : i32
    %13 = arith.extui %12 : i1 to i32
    %c0_i32_6 = arith.constant 0 : i32
    %14 = arith.cmpi ne, %13, %c0_i32_6 : i32
    scf.if %14 {
      %c128_i32_14 = arith.constant 128 : i32
      %29 = arith.muli %arg1, %c128_i32_14 : i32
      %30 = tpu.iota {dimensions = array<i32: 1>} : vector<8x128xi32>
      %31 = vector.broadcast %29 : i32 to vector<8x128xi32>
      %32 = arith.addi %31, %30 : vector<8x128xi32>
      %c8_i32_15 = arith.constant 8 : i32
      %33 = vector.broadcast %c8_i32_15 : i32 to vector<8x128xi32>
      %34 = arith.cmpi slt, %32, %33 : vector<8x128xi32>
      %cst_16 = arith.constant 0xFF800000 : f32
      %35 = vector.broadcast %cst_16 : f32 to vector<8x128xf32>
      %36 = arith.select %34, %8, %35 : vector<8x128xi1>, vector<8x128xf32>
      %c0_17 = arith.constant 0 : index
      %c0_18 = arith.constant 0 : index
      %37 = vector.load %arg5[%c0_17, %c0_18] : memref<8x1xf32, #tpu.memory_space<vmem>>, vector<8x1xf32>
      %cst_19 = arith.constant dense<0xFF800000> : vector<8xf32>
      %38 = vector.multi_reduction <maximumf>, %36, %cst_19 [1] : vector<8x128xf32> to vector<8xf32>
      %39 = vector.shape_cast %38 : vector<8xf32> to vector<8x1xf32>
      %40 = arith.maximumf %37, %39 : vector<8x1xf32>
      %c0_20 = arith.constant 0 : index
      %c0_21 = arith.constant 0 : index
      %41 = vector.load %arg6[%c0_20, %c0_21] : memref<8x1xf32, #tpu.memory_space<vmem>>, vector<8x1xf32>
      %42 = arith.subf %37, %40 : vector<8x1xf32>
      %43 = math.exp %42 : vector<8x1xf32>
      %44 = arith.mulf %41, %43 : vector<8x1xf32>
      %45 = vector.broadcast %40 : vector<8x1xf32> to vector<8x128xf32>
      %46 = arith.subf %36, %45 : vector<8x128xf32>
      %47 = math.exp %46 : vector<8x128xf32>
      %cst_22 = arith.constant dense<0.000000e+00> : vector<8xf32>
      %48 = vector.multi_reduction <add>, %47, %cst_22 [1] : vector<8x128xf32> to vector<8xf32>
      %49 = vector.shape_cast %48 : vector<8xf32> to vector<8x1xf32>
      %50 = arith.addf %44, %49 : vector<8x1xf32>
      %c0_23 = arith.constant 0 : index
      %c0_24 = arith.constant 0 : index
      %51 = vector.load %arg6[%c0_23, %c0_24] : memref<8x1xf32, #tpu.memory_space<vmem>>, vector<8x1xf32>
      tpu.vector_store %arg6[%c0_23, %c0_24], %50 {strides = array<i32>} : memref<8x1xf32, #tpu.memory_space<vmem>>, vector<8x1xf32>,
      %c0_25 = arith.constant 0 : index
      %c0_26 = arith.constant 0 : index
      %52 = vector.load %arg5[%c0_25, %c0_26] : memref<8x1xf32, #tpu.memory_space<vmem>>, vector<8x1xf32>
      tpu.vector_store %arg5[%c0_25, %c0_26], %40 {strides = array<i32>} : memref<8x1xf32, #tpu.memory_space<vmem>>, vector<8x1xf32>,
    } else {
    }
    %c8_i32 = arith.constant 8 : i32
    %15 = arith.muli %arg0, %c8_i32 : i32
    %c1_i32 = arith.constant 1 : i32
    %16 = arith.addi %arg1, %c1_i32 : i32
    %c128_i32_7 = arith.constant 128 : i32
    %17 = arith.muli %16, %c128_i32_7 : i32
    %18 = arith.cmpi slt, %15, %17 : i32
    %c128_i32_8 = arith.constant 128 : i32
    %19 = arith.muli %arg1, %c128_i32_8 : i32
    %c1_i32_9 = arith.constant 1 : i32
    %20 = arith.addi %arg0, %c1_i32_9 : i32
    %c8_i32_10 = arith.constant 8 : i32
    %21 = arith.muli %20, %c8_i32_10 : i32
    %22 = arith.cmpi slt, %19, %21 : i32
    %23 = arith.andi %18, %22 : i1
    %24 = arith.extui %23 : i1 to i32
    %c0_i32_11 = arith.constant 0 : i32
    %25 = arith.cmpi ne, %24, %c0_i32_11 : i32
    scf.if %25 {
      %c8_i32_14 = arith.constant 8 : i32
      %29 = arith.muli %arg0, %c8_i32_14 : i32
      %30 = tpu.iota {dimensions = array<i32: 0>} : vector<8x128xi32>
      %31 = vector.broadcast %29 : i32 to vector<8x128xi32>
      %32 = arith.addi %31, %30 : vector<8x128xi32>
      %c128_i32_15 = arith.constant 128 : i32
      %33 = arith.muli %arg1, %c128_i32_15 : i32
      %34 = tpu.iota {dimensions = array<i32: 1>} : vector<8x128xi32>
      %35 = vector.broadcast %33 : i32 to vector<8x128xi32>
      %36 = arith.addi %35, %34 : vector<8x128xi32>
      %37 = arith.cmpi eq, %32, %36 : vector<8x128xi32>
      %c8_i32_16 = arith.constant 8 : i32
      %38 = vector.broadcast %c8_i32_16 : i32 to vector<8x128xi32>
      %39 = arith.cmpi slt, %36, %38 : vector<8x128xi32>
      %40 = arith.andi %37, %39 : vector<8x128xi1>
      %c0_17 = arith.constant 0 : index
      %c0_18 = arith.constant 0 : index
      %41 = vector.load %arg7[%c0_17, %c0_18] : memref<8x1xf32, #tpu.memory_space<vmem>>, vector<8x1xf32>
      %cst_19 = arith.constant 0.000000e+00 : f32
      %42 = vector.broadcast %cst_19 : f32 to vector<8x128xf32>
      %43 = arith.select %40, %8, %42 : vector<8x128xi1>, vector<8x128xf32>
      %cst_20 = arith.constant dense<0.000000e+00> : vector<8xf32>
      %44 = vector.multi_reduction <add>, %43, %cst_20 [1] : vector<8x128xf32> to vector<8xf32>
      %45 = vector.shape_cast %44 : vector<8xf32> to vector<8x1xf32>
      %46 = arith.addf %41, %45 : vector<8x1xf32>
      %c0_21 = arith.constant 0 : index
      %c0_22 = arith.constant 0 : index
      %47 = vector.load %arg7[%c0_21, %c0_22] : memref<8x1xf32, #tpu.memory_space<vmem>>, vector<8x1xf32>
      tpu.vector_store %arg7[%c0_21, %c0_22], %46 {strides = array<i32>} : memref<8x1xf32, #tpu.memory_space<vmem>>, vector<8x1xf32>,
    } else {
    }
    %c0_i32_12 = arith.constant 0 : i32
    %26 = arith.cmpi eq, %arg1, %c0_i32_12 : i32
    %27 = arith.extui %26 : i1 to i32
    %c0_i32_13 = arith.constant 0 : i32
    %28 = arith.cmpi ne, %27, %c0_i32_13 : i32
    scf.if %28 {
      %c0_14 = arith.constant 0 : index
      %c0_15 = arith.constant 0 : index
      %29 = vector.load %arg5[%c0_14, %c0_15] : memref<8x1xf32, #tpu.memory_space<vmem>>, vector<8x1xf32>
      %c0_16 = arith.constant 0 : index
      %c0_17 = arith.constant 0 : index
      %30 = vector.load %arg6[%c0_16, %c0_17] : memref<8x1xf32, #tpu.memory_space<vmem>>, vector<8x1xf32>
      %31 = math.log %30 : vector<8x1xf32>
      %32 = arith.addf %29, %31 : vector<8x1xf32>
      %c0_18 = arith.constant 0 : index
      %c0_19 = arith.constant 0 : index
      %33 = vector.load %arg7[%c0_18, %c0_19] : memref<8x1xf32, #tpu.memory_space<vmem>>, vector<8x1xf32>
      %34 = arith.subf %32, %33 : vector<8x1xf32>
      %c0_20 = arith.constant 0 : index
      %c0_21 = arith.constant 0 : index
      %35 = vector.load %arg4[%c0_20, %c0_21] : memref<8x1xf32, #tpu.memory_space<vmem>>, vector<8x1xf32>
      tpu.vector_store %arg4[%c0_20, %c0_21], %34 {strides = array<i32>} : memref<8x1xf32, #tpu.memory_space<vmem>>, vector<8x1xf32>,
    } else {
    }
    return
  }
  func.func @transform_0(%arg0: i32, %arg1: i32) -> (i32, i32) {
    %c0_i32 = arith.constant 0 : i32
    %c0_i32_0 = arith.constant 0 : i32
    return %arg0, %c0_i32 : i32, i32
  }
  func.func @transform_1(%arg0: i32, %arg1: i32) -> (i32, i32) {
    %c0_i32 = arith.constant 0 : i32
    %c0_i32_0 = arith.constant 0 : i32
    %c0_i32_1 = arith.constant 0 : i32
    return %c0_i32, %c0_i32_0 : i32, i32
  }
  func.func @transform_2(%arg0: i32, %arg1: i32) -> (i32, i32) {
    %c0_i32 = arith.constant 0 : i32
    %c0_i32_0 = arith.constant 0 : i32
    return %arg0, %c0_i32 : i32, i32
  }
}

</mosaic_0001>

<bundles_post_ra>
// kernel: tpu_custom_call.1
= control target key start
LH: loop header
LB: loop body
LE: loop exit
PB: predicated region body
PF: predicated region fallthrough
CT: control target
= control target key end

     0   :  { %7 = vsyncpa [#allocation6], 0  ;;  %s396_s0 = inlined_call_operand.hbm [shape: f32[8,128], index: 0, kind: input, shape index: {}]   ;;  %s397_s1 = inlined_call_operand.hbm [shape: f32[128,128], index: 1, kind: input, shape index: {}]   ;;  %s398_s2 = inlined_call_operand.vmem [shape: f32[8,1], index: 2, kind: output, shape index: {}]  }
   0x1   :  { %8 = vsyncpa [#allocation8], 0  ;;  %s351_s9 = smov [#allocation5]   ;;  %s352_s11 = smov [#allocation7]  }
   0x2   :  { %s15_s10 = sshll.u32 %s351_s9, 4  ;;  %s24_s12 = sshll.u32 %s352_s11, 4  ;;  %s16_s10 = int_to_ptr.vmem [resolvable:$true] %s15_s10  ;;  %s25_s12 = int_to_ptr.vmem [resolvable:$true] %s24_s12 }
   0x3   :  { %s315_s13 = scalar_lea.vmem %s16_s10, 128  ;;  %p320_p1 = scmp.lt.s32.totalorder %s16_s10, %s16_s10 }
   0x4   :  { %p316_p0 = scmp.ne.s32.totalorder %s16_s10, %s315_s13  ;;  %p321_p2 = scmp.lt.s32.totalorder %s315_s13, %s315_s13 }
   0x6   :  { %p322_p3 = por %p321_p2, %p320_p1 }
   0x8   :  { %p323_p4 = pnand %p322_p3, %p316_p0 }
   0xa   :  { %326 = shalt.err (!%p323_p4)
}
   0xb   :  { %18 = dma.hbm_to_vmem [thread:$0]  %s396_s0, 128, %s16_s10, [#allocation6]  }
   0xc   :  { %s335_s16 = scalar_lea.vmem %s25_s12, 2048  ;;  %p340_p6 = scmp.lt.s32.totalorder %s25_s12, %s25_s12 }
   0xd   :  { %p336_p5 = scmp.ne.s32.totalorder %s25_s12, %s335_s16  ;;  %p341_p7 = scmp.lt.s32.totalorder %s335_s16, %s335_s16 }
   0xf   :  { %p342_p8 = por %p341_p7, %p340_p6 }
  0x11   :  { %p343_p9 = pnand %p342_p8, %p336_p5 }
  0x13   :  { %346 = shalt.err (!%p343_p9)
}
  0x14   :  { %s353_s17 = smov 128   ;;  %s354_s18 = smov 8  }
  0x15   :  { %30 = dma.hbm_to_vmem [thread:$0]  %s397_s1, 2048, %s25_s12, [#allocation8], %s353_s17, %s353_s17, %s354_s18  }
  0x16   :  { %347 = dma.done.wait [#allocation6], 128  }
  0x17   :  { %348 = vsyncadd [#allocation6], 4294967168 }
  0x18   :  { %349 = dma.done.wait [#allocation8], 2048  }
  0x19   :  { %350 = vsyncadd [#allocation8], 4294965248  ;;  %v355_v0 = vmov 0.0   ;;  %vm356_vm0 = vmmov 0   ;;  %v62_v1 = vld [vmem:[#allocation7 + $0x78] sm:$0xff]  ;;  %v61_v2 = vld [vmem:[#allocation7 + $0x70] sm:$0xff]  ;;  %v164_v18 = vlaneseq }
  0x1a   :  { %257 = vmatprep.subr.mxu0 %v355_v0  ;;  %289 = vmatprep.mubr.msk.f32.mxu0 %vm356_vm0, %v355_v0  ;;  %v60_v3 = vld [vmem:[#allocation7 + $0x68] sm:$0xff]  ;;  %v59_v4 = vld [vmem:[#allocation7 + $0x60] sm:$0xff]  ;;  %v58_v5 = vld [vmem:[#allocation7 + $0x58] sm:$0xff]  ;;  %vm41_vm2 = vcmask 7168   ;;  %v357_v21 = vmov -inf   ;;  %v358_v27 = vmov 0  }
  0x1b   :  { %258 = vmatpush3.xpose.msra.mxu0 %v62_v1  ;;  %v57_v6 = vld [vmem:[#allocation7 + $0x50] sm:$0xff]  ;;  %v56_v7 = vld [vmem:[#allocation7 + $0x48] sm:$0xff]  ;;  %v55_v8 = vld [vmem:[#allocation7 + $0x40] sm:$0xff]  ;;  %v165_v19 = vand.u32 127, %v164_v18  ;;  %v205_v20 = vshrl.u32 %v164_v18, 7  ;;  %42 = vst.msk [vmem:[#allocation2] sm:$0xff] %vm41_vm2, %v357_v21  ;;  %300 = vset.pattern.permute.xlu0 %v358_v27 }
  0x1c   :  { %259 = vmatprep.subr.mxu0 %v355_v0  ;;  %v54_v9 = vld [vmem:[#allocation7 + $0x38] sm:$0xff]  ;;  %v53_v10 = vld [vmem:[#allocation7 + $0x30] sm:$0xff]  ;;  %v52_v11 = vld [vmem:[#allocation7 + $0x28] sm:$0xff]  ;;  %43 = vst.msk [vmem:[#allocation3] sm:$0xff] %vm41_vm2, %v355_v0 }
  0x1d   :  { %v51_v12 = vld [vmem:[#allocation7 + $0x20] sm:$0xff]  ;;  %v50_v13 = vld [vmem:[#allocation7 + $0x18] sm:$0xff]  ;;  %v49_v14 = vld [vmem:[#allocation7 + $0x10] sm:$0xff]  ;;  %vm212_vm1 = vcmp.eq.s32.totalorder %v205_v20, %v165_v19  ;;  %44 = vst.msk [vmem:[#allocation4] sm:$0xff] %vm41_vm2, %v355_v0  ;;  %vm168_vm3 = vcmp.lt.s32.totalorder %v165_v19, 8 }
  0x1e   :  { %v48_v15 = vld [vmem:[#allocation7 + $0x8] sm:$0xff]  ;;  %v47_v16 = vld [vmem:[#allocation7] sm:$0xff]  ;;  %v63_v17 = vld [vmem:[#allocation5] sm:$0xff] }
  0x1f   :  { %260 = vmatpush3.xpose.msra.mxu0 %v61_v2  ;;  %vm383_vm4 = vmand %vm212_vm1, %vm168_vm3 }
  0x20   :  { %261 = vmatprep.subr.mxu0 %v355_v0 }
  0x22   :  { %v170_v28 = vld [vmem:[#allocation2] sm:$0xff] }
  0x23   :  { %262 = vmatpush3.xpose.msra.mxu0 %v60_v3  ;;  %v174_v38 = vld [vmem:[#allocation3] sm:$0xff] }
  0x24   :  { %263 = vmatprep.subr.mxu0 %v355_v0  ;;  %v215_v42 = vld [vmem:[#allocation4] sm:$0xff] }
  0x27   :  { %264 = vmatpush3.xpose.msra.mxu0 %v59_v4 }
  0x28   :  { %265 = vmatprep.subr.mxu0 %v355_v0 }
  0x2b   :  { %266 = vmatpush3.xpose.msra.mxu0 %v58_v5 }
  0x2c   :  { %267 = vmatprep.subr.mxu0 %v355_v0 }
  0x2f   :  { %268 = vmatpush3.xpose.msra.mxu0 %v57_v6 }
  0x30   :  { %269 = vmatprep.subr.mxu0 %v355_v0 }
  0x33   :  { %270 = vmatpush3.xpose.msra.mxu0 %v56_v7 }
  0x34   :  { %271 = vmatprep.subr.mxu0 %v355_v0 }
  0x37   :  { %272 = vmatpush3.xpose.msra.mxu0 %v55_v8 }
  0x38   :  { %273 = vmatprep.subr.mxu0 %v355_v0 }
  0x3b   :  { %274 = vmatpush3.xpose.msra.mxu0 %v54_v9 }
  0x3c   :  { %275 = vmatprep.subr.mxu0 %v355_v0 }
  0x3f   :  { %276 = vmatpush3.xpose.msra.mxu0 %v53_v10 }
  0x40   :  { %277 = vmatprep.subr.mxu0 %v355_v0 }
  0x43   :  { %278 = vmatpush3.xpose.msra.mxu0 %v52_v11 }
  0x44   :  { %279 = vmatprep.subr.mxu0 %v355_v0 }
  0x47   :  { %280 = vmatpush3.xpose.msra.mxu0 %v51_v12 }
  0x48   :  { %281 = vmatprep.subr.mxu0 %v355_v0 }
  0x4b   :  { %282 = vmatpush3.xpose.msra.mxu0 %v50_v13 }
  0x4c   :  { %283 = vmatprep.subr.mxu0 %v355_v0 }
  0x4f   :  { %284 = vmatpush3.xpose.msra.mxu0 %v49_v14 }
  0x50   :  { %285 = vmatprep.subr.mxu0 %v355_v0 }
  0x53   :  { %286 = vmatpush3.xpose.msra.mxu0 %v48_v15 }
  0x54   :  { %287 = vmatprep.subr.mxu0 %v355_v0 }
  0x57   :  { %288 = vmatpush3.xpose.msra.mxu0 %v47_v16 }
  0x5a   :  { %290 = vmatmul.mubr.f32.vlgmr.msra.gmra.mxu0 %v63_v17 }
 0x11a   :  { %v130_v23 = vpop.f32.mrf.mxu0 }
 0x11b   :  { %v169_v24 = vsel %vm168_vm3, %v130_v23, -inf  ;;  %v216_v25 = vsel %vm383_vm4, %v130_v23, 0.0 }
 0x11c   :  { %171 = vmax.xlane.f32.xlu0 %v169_v24  ;;  %v291_v26 = vpop.f32.mrf.mxu0 }
 0x1a5   :  { %v172_v29 = vpop.xlane.xlu0 %171 }
 0x1a6   :  { %v173_v30 = vmax.f32 %v170_v28, %v172_v29 }
 0x1a8   :  { %v175_v31 = vsub.f32 %v170_v28, %v173_v30  ;;  %192 = vst.msk [vmem:[#allocation2] sm:$0xff] %vm41_vm2, %v173_v30  ;;  %181 = vperm.xlu0 %300, %v173_v30  }
 0x1aa   :  { %v176_v36 = vmul.f32 1.442695, %v175_v31 }
 0x1af   :  { %v225_v48 = vld [vmem:[#allocation2] sm:$0xff] }
 0x223   :  { %v182_v32 = vpop.permute.xlu0 %181 }
 0x224   :  { %v184_v33 = vsub.f32 %v169_v24, %v182_v32 }
 0x226   :  { %v185_v34 = vmul.f32 1.442695, %v184_v33 }
 0x228   :  { %301 = vpow2.f32 %v185_v34 }
 0x229   :  { %303 = vpow2.f32 %v176_v36 }
 0x235   :  { %v302_v35 = vpop.eup %301 }
 0x236   :  { %187 = vadd.xlane.f32.xlu1 %v302_v35  ;;  %v304_v37 = vpop.eup %303 }
 0x237   :  { %v178_v39 = vmul.f32 %v304_v37, %v174_v38 }
 0x23a   :  { %217 = vadd.xlane.f32.xlu1 %v216_v25 }
 0x2bf   :  { %v188_v40 = vpop.xlane.xlu1 %187 }
 0x2c0   :  { %v189_v41 = vadd.f32 %v188_v40, %v178_v39 }
 0x2c2   :  { %191 = vst.msk [vmem:[#allocation3] sm:$0xff] %vm41_vm2, %v189_v41 }
 0x2c3   :  { %v218_v43 = vpop.xlane.xlu1 %217 }
 0x2c4   :  { %v219_v44 = vadd.f32 %v218_v43, %v215_v42 }
 0x2c6   :  { %221 = vst.msk [vmem:[#allocation4] sm:$0xff] %vm41_vm2, %v219_v44 }
 0x2c9   :  { %v226_v45 = vld [vmem:[#allocation3] sm:$0xff] }
 0x2ca   :  { %305 = vlog2.f32 %v226_v45 }
 0x2cd   :  { %v230_v50 = vld [vmem:[#allocation4] sm:$0xff] }
 0x2d7   :  { %v306_v46 = vpop.eup %305 }
 0x2d8   :  { %v228_v47 = vmul.f32 0.6931472, %v306_v46 }
 0x2da   :  { %v229_v49 = vadd.f32 %v228_v47, %v225_v48 }
 0x2dc   :  { %v231_v51 = vsub.f32 %v229_v49, %v230_v50 }
 0x2de   :  { %233 = vst.msk [vmem:[%s398_s2] sm:$0xff] %vm41_vm2, %v231_v51 }
 0x2df   :  { %238 = vsyncpa [#allocation6], 1 }
 0x2e0   :  { %239 = vsyncpa [#allocation8], 1 }

</bundles_post_ra>
